<compile_context>
chip_gen: v5e
topology: v5e:2x2
jax: 0.10.0
libtpu: 0.0.40
codegen_flags: <defaults>
</compile_context>

<pallas_src>
import jax
import jax.numpy as jnp
from jax.experimental import pallas as pl
from jax.experimental.pallas import tpu as pltpu


def _round_up(x, m):
    return (x + m - 1) // m * m


def _pick_vmem_limit_bytes():
    """Per-generation scoped-VMEM budget (v5e/v6e: 128 MiB physical; v7x: 64 MiB)."""
    try:
        kind = jax.devices()[0].device_kind.lower()
    except Exception:
        return 32 * 1024 * 1024
    if "v5" in kind or "v6" in kind:
        return 64 * 1024 * 1024   # plenty of headroom on 128 MiB parts
    return 32 * 1024 * 1024       # conservative on v7x (64 MiB physical) / unknown


def qnetwork_kernel(x_ref, w1_ref, b1_ref, w2_ref, b2_ref, w3_ref, b3_ref, o_ref):
    # One batch tile per grid step; all weights/biases are VMEM-resident.
    x = x_ref[...]

    # fc1 + ReLU (f32 accumulation on the MXU)
    h1 = jnp.dot(x, w1_ref[...], preferred_element_type=jnp.float32) + b1_ref[...]
    h1 = jnp.maximum(h1, 0.0)

    # fc2 + ReLU
    h2 = jnp.dot(h1.astype(w2_ref.dtype), w2_ref[...],
                 preferred_element_type=jnp.float32) + b2_ref[...]
    h2 = jnp.maximum(h2, 0.0)

    # logits (lane-padded output width; padding columns of w3/b3 are zeros)
    o_ref[...] = (
        jnp.dot(h2.astype(w3_ref.dtype), w3_ref[...],
                preferred_element_type=jnp.float32) + b3_ref[...]
    ).astype(o_ref.dtype)


def qnetwork_forward(x, params, *, tile_batch=1024, use_bf16=False):
    """x: [B, state_size] float32. params: dict of (w1,b1,w2,b2,w3,b3).

    Returns [B, action_size] float32 Q-values.
    """
    w1, b1, w2, b2, w3, b3 = (
        params["w1"], params["b1"], params["w2"], params["b2"],
        params["w3"], params["b3"],
    )
    B, S = x.shape
    A = w3.shape[1]
    LANE = 128

    # --- lane-align the output width (pad w3/b3 columns with zeros) ---------
    A_pad = _round_up(A, LANE)
    w3p = jnp.pad(w3, ((0, 0), (0, A_pad - A))) if A_pad != A else w3
    b3p = jnp.pad(b3, ((0, 0), (0, A_pad - A))) if A_pad != A else b3

    # --- batch tiling: TB multiple of 8, pad B up to a multiple of TB -------
    TB = min(int(tile_batch), _round_up(B, 8))
    TB = _round_up(TB, 8)
    B_pad = _round_up(B, TB)
    xp = jnp.pad(x, ((0, B_pad - B), (0, 0))) if B_pad != B else x

    # --- optional bf16 weights/activations (f32 accumulation kept) ----------
    if use_bf16:
        xp = xp.astype(jnp.bfloat16)
        w1c = w1.astype(jnp.bfloat16)
        w2c = w2.astype(jnp.bfloat16)
        w3c = w3p.astype(jnp.bfloat16)
    else:
        w1c, w2c, w3c = w1, w2, w3p

    grid = (B_pad // TB,)

    resident = lambda shape: pl.BlockSpec(shape, lambda i: (0, 0))

    out = pl.pallas_call(
        qnetwork_kernel,
        out_shape=jax.ShapeDtypeStruct((B_pad, A_pad), jnp.float32),
        grid=grid,
        in_specs=[
            pl.BlockSpec((TB, S), lambda i: (i, 0)),   # x: streamed per batch tile
            resident(w1c.shape), resident(b1.shape),   # weights/biases: VMEM-resident
            resident(w2c.shape), resident(b2.shape),
            resident(w3c.shape), resident(b3p.shape),
        ],
        out_specs=pl.BlockSpec((TB, A_pad), lambda i: (i, 0)),
        compiler_params=pltpu.CompilerParams(
            dimension_semantics=("parallel",),         # 2-TC sharding on v7x
            vmem_limit_bytes=_pick_vmem_limit_bytes(),
        ),
    )(xp, w1c, b1, w2c, b2, w3c, b3p)

    return out[:B, :A]


def init_params(key, state_size, action_size, hidden=(128, 64)):
    """Deterministic init mimicking PyTorch nn.Linear default:
    U(-1/sqrt(fan_in), 1/sqrt(fan_in)). Weights stored as [in, out]."""
    sizes = [state_size, hidden[0], hidden[1], action_size]
    params = {}
    for i in range(3):
        fan_in, fan_out = sizes[i], sizes[i + 1]
        key, kw, kb = jax.random.split(key, 3)
        bound = 1.0 / (fan_in ** 0.5)
        params[f"w{i+1}"] = jax.random.uniform(
            kw, (fan_in, fan_out), jnp.float32, -bound, bound
        )
        params[f"b{i+1}"] = jax.random.uniform(
            kb, (1, fan_out), jnp.float32, -bound, bound
        )
    return params


if __name__ == "__main__":
    key = jax.random.PRNGKey(0)
    batch, state_size, action_size = 2, 8, 4

    kp, kx = jax.random.split(key)
    params = init_params(kp, state_size, action_size)
    x = jax.random.normal(kx, (batch, state_size), jnp.float32)

    out = qnetwork_forward(x, params)
    out = jax.block_until_ready(out)

    # pure-JAX reference check (f32 path)
    ref = x
    ref = jnp.maximum(ref @ params["w1"] + params["b1"], 0.0)
    ref = jnp.maximum(ref @ params["w2"] + params["b2"], 0.0)
    ref = ref @ params["w3"] + params["b3"]
    assert out.shape == (batch, action_size)
    assert jnp.allclose(out, ref, atol=1e-5, rtol=1e-5)

    # also exercise the tiled path with a larger, non-tile-multiple batch
    kx2 = jax.random.split(kx)[0]
    xb = jax.random.normal(kx2, (1030, state_size), jnp.float32)
    outb = jax.block_until_ready(qnetwork_forward(xb, params, tile_batch=512))
    refb = jnp.maximum(xb @ params["w1"] + params["b1"], 0.0)
    refb = jnp.maximum(refb @ params["w2"] + params["b2"], 0.0)
    refb = refb @ params["w3"] + params["b3"]
    assert outb.shape == (1030, action_size)
    assert jnp.allclose(outb, refb, atol=1e-4, rtol=1e-4)

    print("KERNEL_OK")
</pallas_src>

<mosaic_0001>
module attributes {stable_mosaic.version = 11 : i64} {
  func.func @qnetwork_kernel(%arg0: i32, %arg1: memref<8x8xf32, #tpu.memory_space<vmem>>, %arg2: memref<8x128xf32, #tpu.memory_space<vmem>>, %arg3: memref<1x128xf32, #tpu.memory_space<vmem>>, %arg4: memref<128x64xf32, #tpu.memory_space<vmem>>, %arg5: memref<1x64xf32, #tpu.memory_space<vmem>>, %arg6: memref<64x128xf32, #tpu.memory_space<vmem>>, %arg7: memref<1x128xf32, #tpu.memory_space<vmem>>, %arg8: memref<8x128xf32, #tpu.memory_space<vmem>>) attributes {dimension_semantics = [#tpu.dimension_semantics<parallel>], iteration_bounds = array<i64: 1>, scalar_prefetch = 0 : i64, scratch_operands = 0 : i64, tpu.core_type = #tpu.core_type<tc>, window_params = [{transform_indices = @transform_0, window_bounds = array<i64: 8, 8>}, {pipeline_mode = #tpu.pipeline_mode<synchronous>, transform_indices = @transform_1, window_bounds = array<i64: 8, 128>}, {pipeline_mode = #tpu.pipeline_mode<synchronous>, transform_indices = @transform_2, window_bounds = array<i64: 1, 128>}, {pipeline_mode = #tpu.pipeline_mode<synchronous>, transform_indices = @transform_3, window_bounds = array<i64: 128, 64>}, {pipeline_mode = #tpu.pipeline_mode<synchronous>, transform_indices = @transform_4, window_bounds = array<i64: 1, 64>}, {pipeline_mode = #tpu.pipeline_mode<synchronous>, transform_indices = @transform_5, window_bounds = array<i64: 64, 128>}, {pipeline_mode = #tpu.pipeline_mode<synchronous>, transform_indices = @transform_6, window_bounds = array<i64: 1, 128>}, {transform_indices = @transform_7, window_bounds = array<i64: 8, 128>}]} {
    %c0 = arith.constant 0 : index
    %c0_0 = arith.constant 0 : index
    %0 = vector.load %arg1[%c0, %c0_0] : memref<8x8xf32, #tpu.memory_space<vmem>>, vector<8x8xf32>
    %c0_1 = arith.constant 0 : index
    %c0_2 = arith.constant 0 : index
    %1 = vector.load %arg2[%c0_1, %c0_2] : memref<8x128xf32, #tpu.memory_space<vmem>>, vector<8x128xf32>
    %cst = arith.constant dense<0.000000e+00> : vector<8x128xf32>
    %2 = tpu.matmul %0, %1, %cst {dimension_numbers = #tpu.dot_dimension_numbers<[1], [0], [0], [1], [0, 0, 1, 1], [], []>} : vector<8x8xf32>, vector<8x128xf32>, vector<8x128xf32> -> vector<8x128xf32>
    %c0_3 = arith.constant 0 : index
    %c0_4 = arith.constant 0 : index
    %3 = vector.load %arg3[%c0_3, %c0_4] : memref<1x128xf32, #tpu.memory_space<vmem>>, vector<1x128xf32>
    %4 = vector.broadcast %3 : vector<1x128xf32> to vector<8x128xf32>
    %5 = arith.addf %2, %4 : vector<8x128xf32>
    %cst_5 = arith.constant 0.000000e+00 : f32
    %6 = vector.broadcast %cst_5 : f32 to vector<8x128xf32>
    %7 = arith.maximumf %5, %6 : vector<8x128xf32>
    %c0_6 = arith.constant 0 : index
    %c0_7 = arith.constant 0 : index
    %8 = vector.load %arg4[%c0_6, %c0_7] : memref<128x64xf32, #tpu.memory_space<vmem>>, vector<128x64xf32>
    %cst_8 = arith.constant dense<0.000000e+00> : vector<8x64xf32>
    %9 = tpu.matmul %7, %8, %cst_8 {dimension_numbers = #tpu.dot_dimension_numbers<[1], [0], [0], [1], [0, 0, 1, 1], [], []>} : vector<8x128xf32>, vector<128x64xf32>, vector<8x64xf32> -> vector<8x64xf32>
    %c0_9 = arith.constant 0 : index
    %c0_10 = arith.constant 0 : index
    %10 = vector.load %arg5[%c0_9, %c0_10] : memref<1x64xf32, #tpu.memory_space<vmem>>, vector<1x64xf32>
    %11 = vector.broadcast %10 : vector<1x64xf32> to vector<8x64xf32>
    %12 = arith.addf %9, %11 : vector<8x64xf32>
    %cst_11 = arith.constant 0.000000e+00 : f32
    %13 = vector.broadcast %cst_11 : f32 to vector<8x64xf32>
    %14 = arith.maximumf %12, %13 : vector<8x64xf32>
    %c0_12 = arith.constant 0 : index
    %c0_13 = arith.constant 0 : index
    %15 = vector.load %arg6[%c0_12, %c0_13] : memref<64x128xf32, #tpu.memory_space<vmem>>, vector<64x128xf32>
    %cst_14 = arith.constant dense<0.000000e+00> : vector<8x128xf32>
    %16 = tpu.matmul %14, %15, %cst_14 {dimension_numbers = #tpu.dot_dimension_numbers<[1], [0], [0], [1], [0, 0, 1, 1], [], []>} : vector<8x64xf32>, vector<64x128xf32>, vector<8x128xf32> -> vector<8x128xf32>
    %c0_15 = arith.constant 0 : index
    %c0_16 = arith.constant 0 : index
    %17 = vector.load %arg7[%c0_15, %c0_16] : memref<1x128xf32, #tpu.memory_space<vmem>>, vector<1x128xf32>
    %18 = vector.broadcast %17 : vector<1x128xf32> to vector<8x128xf32>
    %19 = arith.addf %16, %18 : vector<8x128xf32>
    %c0_17 = arith.constant 0 : index
    %c0_18 = arith.constant 0 : index
    %20 = vector.load %arg8[%c0_17, %c0_18] : memref<8x128xf32, #tpu.memory_space<vmem>>, vector<8x128xf32>
    tpu.vector_store %arg8[%c0_17, %c0_18], %19 {strides = array<i32>} : memref<8x128xf32, #tpu.memory_space<vmem>>, vector<8x128xf32>,
    return
  }
  func.func @transform_0(%arg0: i32) -> (i32, i32) {
    %c0_i32 = arith.constant 0 : i32
    %c0_i32_0 = arith.constant 0 : i32
    return %arg0, %c0_i32 : i32, i32
  }
  func.func @transform_1(%arg0: i32) -> (i32, i32) {
    %c0_i32 = arith.constant 0 : i32
    %c0_i32_0 = arith.constant 0 : i32
    %c0_i32_1 = arith.constant 0 : i32
    return %c0_i32, %c0_i32_0 : i32, i32
  }
  func.func @transform_2(%arg0: i32) -> (i32, i32) {
    %c0_i32 = arith.constant 0 : i32
    %c0_i32_0 = arith.constant 0 : i32
    %c0_i32_1 = arith.constant 0 : i32
    return %c0_i32, %c0_i32_0 : i32, i32
  }
  func.func @transform_3(%arg0: i32) -> (i32, i32) {
    %c0_i32 = arith.constant 0 : i32
    %c0_i32_0 = arith.constant 0 : i32
    %c0_i32_1 = arith.constant 0 : i32
    return %c0_i32, %c0_i32_0 : i32, i32
  }
  func.func @transform_4(%arg0: i32) -> (i32, i32) {
    %c0_i32 = arith.constant 0 : i32
    %c0_i32_0 = arith.constant 0 : i32
    %c0_i32_1 = arith.constant 0 : i32
    return %c0_i32, %c0_i32_0 : i32, i32
  }
  func.func @transform_5(%arg0: i32) -> (i32, i32) {
    %c0_i32 = arith.constant 0 : i32
    %c0_i32_0 = arith.constant 0 : i32
    %c0_i32_1 = arith.constant 0 : i32
    return %c0_i32, %c0_i32_0 : i32, i32
  }
  func.func @transform_6(%arg0: i32) -> (i32, i32) {
    %c0_i32 = arith.constant 0 : i32
    %c0_i32_0 = arith.constant 0 : i32
    %c0_i32_1 = arith.constant 0 : i32
    return %c0_i32, %c0_i32_0 : i32, i32
  }
  func.func @transform_7(%arg0: i32) -> (i32, i32) {
    %c0_i32 = arith.constant 0 : i32
    %c0_i32_0 = arith.constant 0 : i32
    return %arg0, %c0_i32 : i32, i32
  }
}

</mosaic_0001>

<bundles_post_ra>
// kernel: tpu_custom_call.1
= control target key start
LH: loop header
LB: loop body
LE: loop exit
PB: predicated region body
PF: predicated region fallthrough
CT: control target
= control target key end

     0   :  { %vm33_vm0 = vcmask 64512   ;;  %s315_s0 = inlined_call_operand.vmem [shape: f32[8,8], index: 0, kind: input, shape index: {}]   ;;  %s316_s1 = inlined_call_operand.vmem [shape: f32[8,128], index: 1, kind: input, shape index: {}]   ;;  %s317_s2 = inlined_call_operand.vmem [shape: f32[1,128], index: 2, kind: input, shape index: {}]   ;;  %s318_s3 = inlined_call_operand.vmem [shape: f32[128,64], index: 3, kind: input, shape index: {}]   ;;  %s319_s4 = inlined_call_operand.vmem [shape: f32[1,64], index: 4, kind: input, shape index: {}]   ;;  %s320_s5 = inlined_call_operand.vmem [shape: f32[64,128], index: 5, kind: input, shape index: {}]   ;;  %s321_s6 = inlined_call_operand.vmem [shape: f32[1,128], index: 6, kind: input, shape index: {}]   ;;  %s322_s7 = inlined_call_operand.hbm [shape: f32[8,128], index: 7, kind: output, shape index: {}]  }
   0x1   :  { %v28_v0 = vld [vmem:[%s316_s1] sm:$0xff]  ;;  %v73_v2 = vld [vmem:[%s318_s3 + $0x78] sm:$0xff]  ;;  %v72_v3 = vld [vmem:[%s318_s3 + $0x70] sm:$0xff] }
   0x2   :  { %v27_v1 = vld [vmem:[%s315_s0] sm:$0xff]  ;;  %52 = vmatpush.msra.mxu0 %v28_v0  ;;  %78 = vmatpush.msra.mxu1 %v73_v2  ;;  %v71_v4 = vld [vmem:[%s318_s3 + $0x68] sm:$0xff]  ;;  %v69_v6 = vld [vmem:[%s318_s3 + $0x58] sm:$0xff] }
   0x3   :  { %152 = vmatmul.msk.f32.vlgmr.msra.gmra.mxu0 %vm33_vm0, %v27_v1  ;;  %v70_v5 = vld [vmem:[%s318_s3 + $0x60] sm:$0xff] }
   0x4   :  { %79 = vmatpush.msra.mxu1 %v72_v3 }
   0x6   :  { %80 = vmatpush.msra.mxu1 %v71_v4 }
   0x7   :  { %12 = vsyncpa [#allocation3], 0  ;;  %v68_v7 = vld [vmem:[%s318_s3 + $0x50] sm:$0xff]  ;;  %v67_v8 = vld [vmem:[%s318_s3 + $0x48] sm:$0xff]  ;;  %vm111_vm1 = vcmask 523264   ;;  %s184_s30 = smov [#allocation2]  }
   0x8   :  { %81 = vmatpush.msra.mxu1 %v70_v5  ;;  %v66_v9 = vld [vmem:[%s318_s3 + $0x40] sm:$0xff]  ;;  %v65_v10 = vld [vmem:[%s318_s3 + $0x38] sm:$0xff]  ;;  %v64_v11 = vld [vmem:[%s318_s3 + $0x30] sm:$0xff]  ;;  %s141_s8 = sshll.u32 %s184_s30, 4  ;;  %s142_s8 = int_to_ptr.vmem [resolvable:$true] %s141_s8 }
   0x9   :  { %v63_v12 = vld [vmem:[%s318_s3 + $0x28] sm:$0xff]  ;;  %v62_v13 = vld [vmem:[%s318_s3 + $0x20] sm:$0xff]  ;;  %v61_v14 = vld [vmem:[%s318_s3 + $0x18] sm:$0xff] }
   0xa   :  { %82 = vmatpush.msra.mxu1 %v69_v6  ;;  %v60_v15 = vld [vmem:[%s318_s3 + $0x10] sm:$0xff]  ;;  %v59_v16 = vld [vmem:[%s318_s3 + $0x8] sm:$0xff]  ;;  %v58_v17 = vld [vmem:[%s318_s3] sm:$0xff] }
   0xb   :  { %v106_v18 = vld [vmem:[%s320_s5 + $0x38] sm:$0xff]  ;;  %v105_v19 = vld [vmem:[%s320_s5 + $0x30] sm:$0xff]  ;;  %v104_v20 = vld [vmem:[%s320_s5 + $0x28] sm:$0xff] }
   0xc   :  { %83 = vmatpush.msra.mxu1 %v68_v7  ;;  %123 = vmatpush.msra.mxu2 %v106_v18  ;;  %v103_v21 = vld [vmem:[%s320_s5 + $0x20] sm:$0xff]  ;;  %v102_v22 = vld [vmem:[%s320_s5 + $0x18] sm:$0xff]  ;;  %v101_v27 = vld [vmem:[%s320_s5 + $0x10] sm:$0xff] }
   0xd   :  { %v155_v23 = vld [vmem:[%s317_s2] ss:$0 sm:$0xff]  ;;  %v100_v28 = vld [vmem:[%s320_s5 + $0x8] sm:$0xff] }
   0xe   :  { %84 = vmatpush.msra.mxu1 %v67_v8  ;;  %124 = vmatpush.msra.mxu2 %v105_v19  ;;  %v99_v29 = vld [vmem:[%s320_s5] sm:$0xff]  ;;  %s143_s5 = sshll.u32 %s322_s7, 4  ;;  %s144_s5 = int_to_ptr.hbm [resolvable:$true] %s143_s5 }
   0xf   :  { %v156_v30 = vld [vmem:[%s319_s4] ss:$0 sm:$0xff] }
  0x10   :  { %85 = vmatpush.msra.mxu1 %v66_v9  ;;  %125 = vmatpush.msra.mxu2 %v104_v20  ;;  %v157_v34 = vld [vmem:[%s321_s6] ss:$0 sm:$0xff] }
  0x12   :  { %86 = vmatpush.msra.mxu1 %v65_v10  ;;  %126 = vmatpush.msra.mxu2 %v103_v21 }
  0x14   :  { %87 = vmatpush.msra.mxu1 %v64_v11  ;;  %127 = vmatpush.msra.mxu2 %v102_v22 }
  0x16   :  { %88 = vmatpush.msra.mxu1 %v63_v12  ;;  %128 = vmatpush.msra.mxu2 %v101_v27 }
  0x18   :  { %89 = vmatpush.msra.mxu1 %v62_v13  ;;  %129 = vmatpush.msra.mxu2 %v100_v28 }
  0x1a   :  { %90 = vmatpush.msra.mxu1 %v61_v14  ;;  %130 = vmatpush.msra.mxu2 %v99_v29 }
  0x1c   :  { %91 = vmatpush.msra.mxu1 %v60_v15 }
  0x1e   :  { %92 = vmatpush.msra.mxu1 %v59_v16 }
  0x20   :  { %93 = vmatpush.msra.mxu1 %v58_v17 }
  0x80   :  { %v54_v24 = vpop.f32.mrf.mxu0 }
  0x81   :  { %v55_v25 = vadd.f32 %v155_v23, %v54_v24 }
  0x83   :  { %v57_v26 = vmax.f32 %v55_v25, 0.0 }
  0x85   :  { %94 = vmatmul.f32.vlgmr.msra.gmra.mxu1 %v57_v26 }
 0x102   :  { %v95_v31 = vpop.f32.mrf.mxu1 }
 0x103   :  { %v96_v32 = vadd.f32 %v156_v30, %v95_v31 }
 0x105   :  { %v98_v33 = vmax.f32 %v96_v32, 0.0 }
 0x107   :  { %153 = vmatmul.msk.f32.vlgmr.msra.gmra.mxu2 %vm111_vm1, %v98_v33 }
 0x18a   :  { %v132_v35 = vpop.f32.mrf.mxu2 }
 0x18b   :  { %v133_v36 = vadd.f32 %v157_v34, %v132_v35 }
 0x18d   :  { %135 = vst [vmem:[#allocation2] sm:$0xff] %v133_v36 }
 0x18e   :  { %146 = dma.vmem_to_hbm [thread:$0]  %s142_s8, 128, %s144_s5, [#allocation3]  }
 0x18f   :  { %182 = dma.done.wait [#allocation3], 128  }
 0x190   :  { %183 = vsyncadd [#allocation3], 4294967168 }
 0x191   :  { %151 = vsyncpa [#allocation3], 1 }

</bundles_post_ra>
